<compile_context>
chip_gen: v5e
topology: v5e:2x2
jax: 0.10.0
libtpu: 0.0.40
codegen_flags: <defaults>
</compile_context>

<pallas_src>
import functools
import math

import jax
import jax.numpy as jnp
from jax import lax
from jax.experimental import pallas as pl
from jax.experimental.pallas import tpu as pltpu

_MIB = 1024 * 1024


def _sdpa_kernel(q_ref, k_ref, v_ref, out_ref, score_ref):
    # Blocks: q (1, TQ, D), k/v (1, L, D), out (1, TQ, D), score (1, TQ, L).
    d_tensor = q_ref.shape[-1]
    scale = 1.0 / math.sqrt(d_tensor)

    # Fold the 1/sqrt(d) scale into q in its native dtype (keeps bf16 MXU path;
    # TQ*D multiplies instead of TQ*L after the matmul).
    q = q_ref[0] * jnp.asarray(scale, q_ref.dtype)    # (TQ, D), input dtype
    k = k_ref[0]                                      # (L, D)
    v = v_ref[0]                                      # (L, D)

    # score = q @ k^T : contraction on the shared last dim -> no k.T / transpose.
    s = lax.dot_general(
        q, k,
        dimension_numbers=(((1,), (1,)), ((), ())),
        preferred_element_type=jnp.float32,
    )                                                 # (TQ, L), f32

    # Numerically-stable softmax over the last dim (f32 elementwise throughout).
    m = jnp.max(s, axis=-1, keepdims=True)            # (TQ, 1)
    e = jnp.exp(s - m)                                # (TQ, L)
    denom = jnp.sum(e, axis=-1, keepdims=True)        # (TQ, 1)
    p = e * pl.reciprocal(denom, approx=False)        # (TQ, L)

    # out = p @ v  (cast p to v's dtype before the MXU; f32 accumulation).
    out = jnp.dot(p.astype(v.dtype), v, preferred_element_type=jnp.float32)

    score_ref[0] = p.astype(score_ref.dtype)
    out_ref[0] = out.astype(out_ref.dtype)


def _vmem_capacity_bytes() -> int:
    """Physical VMEM per TensorCore; conservative fallback if query fails."""
    try:
        info = pltpu.get_tpu_info()
        cap = getattr(info, "vmem_capacity_bytes", None)
        if cap:
            return int(cap)
    except Exception:
        pass
    return 64 * _MIB  # v7x-conservative default


def _footprint_bytes(tq, L, D, in_itemsize, score_itemsize, kv_buffers):
    """Per-step VMEM footprint for a given query tile."""
    qo = 2 * 2 * tq * D * in_itemsize                  # q + out tiles, double buffered
    score = 2 * tq * L * score_itemsize                # score output tile, double buffered
    kv = kv_buffers * 2 * L * D * in_itemsize          # resident K + V buffers
    temps = 3 * tq * L * 4                             # f32 softmax temps (s, e, p)
    return qo + score + kv + temps


def _pick_query_tile(L, D, in_itemsize, score_itemsize, budget, kv_buffers):
    # Prefer 256 (beyond that buys <1% on a store-bound kernel), then 128.
    fitting = None
    dividing = None
    for t in (256, 128):
        if L % t == 0:
            if dividing is None:
                dividing = t
            if _footprint_bytes(t, L, D, in_itemsize, score_itemsize,
                                kv_buffers) <= budget and fitting is None:
                fitting = t
    if fitting is not None:
        return fitting
    if dividing is not None:
        return dividing  # over budget; vmem_limit is raised accordingly
    # Small / ragged lengths: one full-row block (== full array dim).
    return L


@functools.partial(jax.jit, static_argnames=("score_dtype",))
def scale_dot_product_attention(q, k, v, score_dtype=None):
    """q, k, v: (head, length, d_tensor). Returns (out, score)."""
    H, L, D = k.shape
    in_itemsize = jnp.dtype(q.dtype).itemsize
    out_score_dtype = jnp.dtype(score_dtype) if score_dtype is not None else jnp.dtype(q.dtype)
    score_itemsize = out_score_dtype.itemsize

    vmem_cap = _vmem_capacity_bytes()
    budget = int(vmem_cap * 0.75)

    # K/V are index-map constant across the query axis; drop to single buffering
    # when double-buffering them would crowd out the score tile (v7x, long L).
    kv_buffers = 2
    if 2 * 2 * L * D * in_itemsize > budget // 2:
        kv_buffers = 1

    tq = _pick_query_tile(L, D, in_itemsize, score_itemsize, budget, kv_buffers)

    footprint = _footprint_bytes(tq, L, D, in_itemsize, score_itemsize, kv_buffers)
    vmem_limit = int(min(0.9 * vmem_cap, max(32 * _MIB, 1.5 * footprint)))

    kv_kwargs = {}
    if kv_buffers == 1:
        kv_kwargs = dict(pipeline_mode=pl.Buffered(1))

    out_shape = (
        jax.ShapeDtypeStruct((H, L, D), q.dtype),          # attention output
        jax.ShapeDtypeStruct((H, L, L), out_score_dtype),  # softmax probabilities
    )

    grid_spec = pltpu.PrefetchScalarGridSpec(
        num_scalar_prefetch=0,
        grid=(H, L // tq),
        in_specs=[
            pl.BlockSpec((1, tq, D), lambda h, i: (h, i, 0)),              # q row tile
            pl.BlockSpec((1, L, D), lambda h, i: (h, 0, 0), **kv_kwargs),  # k: resident per head
            pl.BlockSpec((1, L, D), lambda h, i: (h, 0, 0), **kv_kwargs),  # v: resident per head
        ],
        out_specs=[
            pl.BlockSpec((1, tq, D), lambda h, i: (h, i, 0)),   # out row tile
            pl.BlockSpec((1, tq, L), lambda h, i: (h, i, 0)),   # score row tile (lane-dense)
        ],
    )

    return pl.pallas_call(
        _sdpa_kernel,
        out_shape=out_shape,
        grid_spec=grid_spec,
        compiler_params=pltpu.CompilerParams(
            # Head-only megacore sharding: both TCs sharing one head's K/V would
            # duplicate HBM traffic and resident VMEM on v7x.
            dimension_semantics=("parallel", "arbitrary"),
            vmem_limit_bytes=vmem_limit,
        ),
    )(q, k, v)


def _reference(q, k, v):
    d = k.shape[-1]
    s = jnp.einsum("hld,hmd->hlm", q, k) / math.sqrt(d)
    p = jax.nn.softmax(s, axis=-1)
    return jnp.einsum("hlm,hmd->hld", p, v), p


if __name__ == "__main__":
    head, length, d_tensor = 2, 8, 32

    key = jax.random.PRNGKey(0)
    kq, kk, kv = jax.random.split(key, 3)
    q = jax.random.normal(kq, (head, length, d_tensor), dtype=jnp.float32)
    k = jax.random.normal(kk, (head, length, d_tensor), dtype=jnp.float32)
    v = jax.random.normal(kv, (head, length, d_tensor), dtype=jnp.float32)

    out, score = scale_dot_product_attention(q, k, v)
    out = jax.block_until_ready(out)
    score = jax.block_until_ready(score)

    ref_out, ref_score = _reference(q, k, v)
    assert jnp.allclose(out, ref_out, atol=1e-5, rtol=1e-5)
    assert jnp.allclose(score, ref_score, atol=1e-5, rtol=1e-5)

    print("KERNEL_OK")
</pallas_src>

<mosaic_0001>
module attributes {stable_mosaic.version = 11 : i64} {
  func.func @_sdpa_kernel(%arg0: i32, %arg1: i32, %arg2: memref<1x8x32xf32, #tpu.memory_space<vmem>>, %arg3: memref<1x8x32xf32, #tpu.memory_space<vmem>>, %arg4: memref<1x8x32xf32, #tpu.memory_space<vmem>>, %arg5: memref<1x8x32xf32, #tpu.memory_space<vmem>>, %arg6: memref<1x8x8xf32, #tpu.memory_space<vmem>>) attributes {dimension_semantics = [#tpu.dimension_semantics<parallel>, #tpu.dimension_semantics<arbitrary>], iteration_bounds = array<i64: 2, 1>, scalar_prefetch = 0 : i64, scratch_operands = 0 : i64, tpu.core_type = #tpu.core_type<tc>, window_params = [{transform_indices = @transform_0, window_bounds = array<i64: 1, 8, 32>}, {transform_indices = @transform_1, window_bounds = array<i64: 1, 8, 32>}, {transform_indices = @transform_2, window_bounds = array<i64: 1, 8, 32>}, {transform_indices = @transform_3, window_bounds = array<i64: 1, 8, 32>}, {transform_indices = @transform_4, window_bounds = array<i64: 1, 8, 8>}]} {
    %c0 = arith.constant 0 : index
    %c0_0 = arith.constant 0 : index
    %c0_1 = arith.constant 0 : index
    %0 = vector.load %arg2[%c0, %c0_0, %c0_1] : memref<1x8x32xf32, #tpu.memory_space<vmem>>, vector<1x8x32xf32>
    %1 = vector.shape_cast %0 : vector<1x8x32xf32> to vector<8x32xf32>
    %cst = arith.constant 0.176776692 : f32
    %2 = vector.broadcast %cst : f32 to vector<8x32xf32>
    %3 = arith.mulf %1, %2 : vector<8x32xf32>
    %c0_2 = arith.constant 0 : index
    %c0_3 = arith.constant 0 : index
    %c0_4 = arith.constant 0 : index
    %4 = vector.load %arg3[%c0_2, %c0_3, %c0_4] : memref<1x8x32xf32, #tpu.memory_space<vmem>>, vector<1x8x32xf32>
    %5 = vector.shape_cast %4 : vector<1x8x32xf32> to vector<8x32xf32>
    %c0_5 = arith.constant 0 : index
    %c0_6 = arith.constant 0 : index
    %c0_7 = arith.constant 0 : index
    %6 = vector.load %arg4[%c0_5, %c0_6, %c0_7] : memref<1x8x32xf32, #tpu.memory_space<vmem>>, vector<1x8x32xf32>
    %7 = vector.shape_cast %6 : vector<1x8x32xf32> to vector<8x32xf32>
    %cst_8 = arith.constant dense<0.000000e+00> : vector<8x8xf32>
    %8 = tpu.matmul %3, %5, %cst_8 {dimension_numbers = #tpu.dot_dimension_numbers<[1], [1], [0], [0], [0, 0, 1, 0], [], []>} : vector<8x32xf32>, vector<8x32xf32>, vector<8x8xf32> -> vector<8x8xf32>
    %cst_9 = arith.constant dense<0xFF800000> : vector<8xf32>
    %9 = vector.multi_reduction <maximumf>, %8, %cst_9 [1] : vector<8x8xf32> to vector<8xf32>
    %10 = vector.shape_cast %9 : vector<8xf32> to vector<8x1xf32>
    %11 = vector.broadcast %10 : vector<8x1xf32> to vector<8x8xf32>
    %12 = arith.subf %8, %11 : vector<8x8xf32>
    %13 = math.exp %12 : vector<8x8xf32>
    %cst_10 = arith.constant dense<0.000000e+00> : vector<8xf32>
    %14 = vector.multi_reduction <add>, %13, %cst_10 [1] : vector<8x8xf32> to vector<8xf32>
    %15 = vector.shape_cast %14 : vector<8xf32> to vector<8x1xf32>
    %16 = tpu.reciprocal %15 : vector<8x1xf32> -> vector<8x1xf32>
    %17 = vector.broadcast %16 : vector<8x1xf32> to vector<8x8xf32>
    %18 = arith.mulf %13, %17 : vector<8x8xf32>
    %cst_11 = arith.constant dense<0.000000e+00> : vector<8x32xf32>
    %19 = tpu.matmul %18, %7, %cst_11 {dimension_numbers = #tpu.dot_dimension_numbers<[1], [0], [0], [1], [0, 0, 1, 1], [], []>} : vector<8x8xf32>, vector<8x32xf32>, vector<8x32xf32> -> vector<8x32xf32>
    %c0_12 = arith.constant 0 : index
    %c0_13 = arith.constant 0 : index
    %c0_14 = arith.constant 0 : index
    %20 = vector.load %arg6[%c0_12, %c0_13, %c0_14] : memref<1x8x8xf32, #tpu.memory_space<vmem>>, vector<1x8x8xf32>
    %21 = vector.shape_cast %20 : vector<1x8x8xf32> to vector<8x8xf32>
    %22 = vector.shape_cast %18 : vector<8x8xf32> to vector<1x8x8xf32>
    tpu.vector_store %arg6[%c0_12, %c0_13, %c0_14], %22 {strides = array<i32>} : memref<1x8x8xf32, #tpu.memory_space<vmem>>, vector<1x8x8xf32>,
    %c0_15 = arith.constant 0 : index
    %c0_16 = arith.constant 0 : index
    %c0_17 = arith.constant 0 : index
    %23 = vector.load %arg5[%c0_15, %c0_16, %c0_17] : memref<1x8x32xf32, #tpu.memory_space<vmem>>, vector<1x8x32xf32>
    %24 = vector.shape_cast %23 : vector<1x8x32xf32> to vector<8x32xf32>
    %25 = vector.shape_cast %19 : vector<8x32xf32> to vector<1x8x32xf32>
    tpu.vector_store %arg5[%c0_15, %c0_16, %c0_17], %25 {strides = array<i32>} : memref<1x8x32xf32, #tpu.memory_space<vmem>>, vector<1x8x32xf32>,
    return
  }
  func.func @transform_0(%arg0: i32, %arg1: i32) -> (i32, i32, i32) {
    %c0_i32 = arith.constant 0 : i32
    %c0_i32_0 = arith.constant 0 : i32
    return %arg0, %arg1, %c0_i32 : i32, i32, i32
  }
  func.func @transform_1(%arg0: i32, %arg1: i32) -> (i32, i32, i32) {
    %c0_i32 = arith.constant 0 : i32
    %c0_i32_0 = arith.constant 0 : i32
    %c0_i32_1 = arith.constant 0 : i32
    return %arg0, %c0_i32, %c0_i32_0 : i32, i32, i32
  }
  func.func @transform_2(%arg0: i32, %arg1: i32) -> (i32, i32, i32) {
    %c0_i32 = arith.constant 0 : i32
    %c0_i32_0 = arith.constant 0 : i32
    %c0_i32_1 = arith.constant 0 : i32
    return %arg0, %c0_i32, %c0_i32_0 : i32, i32, i32
  }
  func.func @transform_3(%arg0: i32, %arg1: i32) -> (i32, i32, i32) {
    %c0_i32 = arith.constant 0 : i32
    %c0_i32_0 = arith.constant 0 : i32
    return %arg0, %arg1, %c0_i32 : i32, i32, i32
  }
  func.func @transform_4(%arg0: i32, %arg1: i32) -> (i32, i32, i32) {
    %c0_i32 = arith.constant 0 : i32
    %c0_i32_0 = arith.constant 0 : i32
    return %arg0, %arg1, %c0_i32 : i32, i32, i32
  }
}

</mosaic_0001>

<bundles_post_ra>
// kernel: scale_dot_product_attention.1
= control target key start
LH: loop header
LB: loop body
LE: loop exit
PB: predicated region body
PF: predicated region fallthrough
CT: control target
= control target key end

     0   :  { %s1116_s0 = inlined_call_operand.hbm [shape: f32[2,8,32], index: 0, kind: input, shape index: {}]   ;;  %s1117_s1 = inlined_call_operand.hbm [shape: f32[2,8,32], index: 1, kind: input, shape index: {}]   ;;  %s1118_s2 = inlined_call_operand.hbm [shape: f32[2,8,32], index: 2, kind: input, shape index: {}]   ;;  %s1119_s3 = inlined_call_operand.hbm [shape: f32[2,8,32], index: 3, kind: output, shape index: {0}]   ;;  %s1120_s4 = inlined_call_operand.hbm [shape: f32[2,8,8], index: 4, kind: output, shape index: {1}]  }
   0x1   :  { %1124 = sst [smem:[#allocation19_spill]] %s1117_s1 }
   0x2   :  { %10 = vsyncpa [#allocation3], 0 }
   0x3   :  { %12 = vsyncpa [#allocation3 + $0x1], 0 }
   0x4   :  { %13 = vsyncpa [#allocation6], 0 }
   0x5   :  { %15 = vsyncpa [#allocation6 + $0x1], 0 }
   0x6   :  { %16 = vsyncpa [#allocation4], 0 }
   0x7   :  { %18 = vsyncpa [#allocation4 + $0x1], 0 }
   0x8   :  { %19 = vsyncpa [#allocation10], 0 }
   0x9   :  { %21 = vsyncpa [#allocation10 + $0x1], 0  ;;  %s936_s15 = smov 0   ;;  %s938_s16 = smov 0  }
   0xa   :  { %s940_s17 = smov 0   ;;  %s942_s18 = smov 0  }
   0xb   :  { %s944_s19 = smov 0   ;;  %s946_s20 = smov 0  }
   0xc LB: > { %1125 = sst [smem:[#allocation15_spill]] %s897_s17  ;;  %s967_s21 = sadd.s32 4294967295, %s909_s20   ;;  %s909_s20 = sphi %s946_s20, %s27_s20   ;;  %s905_s19 = sphi %s944_s19, %s1139_s19   ;;  %s901_s18 = sphi %s942_s18, %s1138_s18   ;;  %s897_s17 = sphi %s940_s17, %s1137_s17   ;;  %s893_s16 = sphi %s938_s16, %s1141_s16   ;;  %s889_s15 = sphi %s936_s15, %s1140_s15  }
   0xd   : > { %1126 = sst [smem:[#allocation16_spill]] %s905_s19  ;;  %s596_s22 = sadd.s32 4294967294, %s909_s20  }
   0xe   : > { %s39_s23 = sadd.s32 1, %s905_s19  ;;  %s48_s24 = sadd.s32 1, %s897_s17 }
   0xf   : > { %p41_p0 = scmp.ge.s32.totalorder %s39_s23, 2  ;;  %p55_p1 = scmp.ne.s32.totalorder %s897_s17, %s893_s16 }
  0x10   : > { %p56_p2 = scmp.eq.s32.totalorder %s909_s20, 0  ;;  %p61_p3 = scmp.ne.s32.totalorder %s893_s16, %s889_s15 }
  0x11   : > { %s1143_s23 = smov (%p41_p0, %s39_s23), 0  ;;  %p62_p5 = scmp.eq.s32.totalorder %s967_s21, 0 }
  0x12   : > { %1127 = sst [smem:[#allocation17_spill]] %s1143_s23  ;;  %p979_p4 = por %p56_p2, %p55_p1 }
  0x13   : > { %s43_s26 = ssub.s32 %s905_s19, %s1143_s23  ;;  %p139_p6 = scmp.eq.s32.totalorder %s967_s21, 1 }
  0x14   : > { %p46_p7 = scmp.eq.s32.totalorder %s43_s26, 0  ;;  %p987_p8 = por %p62_p5, %p61_p3 }
  0x15   : > { %p991_p9 = por %p139_p6, %p55_p1  ;;  %p145_p10 = scmp.eq.s32.totalorder %s596_s22, 1 }
  0x16   : > { %s996_s29 = scalar_select %p46_p7, %s897_s17, %s48_s24  }
  0x17   : > { %p998_p11 = por %p145_p10, %p61_p3  ;;  %p598_p12 = scmp.ge.s32.totalorder %s909_s20, 2 }
  0x18   : > { %1131 = sst [smem:[#allocation18_spill]] %s996_s29  ;;  %p647_p13 = scmp.lt.s32.totalorder %s909_s20, 2 }
  0x19   : > { %s193_s5 = sand.u32 1, %s897_s17   ;;  %s600_s7 = sshll.u32 %s905_s19, 3 }
  0x1a   : > { %s599_s6 = sshll.u32 %s193_s5, 3  ;;  %p1008_p0 = pnand %p647_p13, %p979_p4 }
  0x1b   : > { %s213_s9 = sand.u32 1, %s909_s20   ;;  %s1134_s1 = sld [smem:[#allocation19_spill]] }
  0x1c   : > { %s217_s14 = scalar_lea.vmem [#allocation5], %s599_s6  ;;  %s214_s24 = scalar_lea.sflag [#allocation6], %s213_s9 }
  0x1d   : > { %s225_s22 = sshll.u32 %s217_s14, 4  ;;  %p605_p1 = scmp.ge.s32.totalorder %s909_s20, 1  ;;  %s226_s22 = int_to_ptr.vmem [resolvable:$true] %s225_s22 }
  0x1e   : > { %p249_p2 = scmp.lt.s32.totalorder %s909_s20, 3  ;;  %s202_s10 = scalar_lea.hbm %s1116_s0, %s600_s7 }
  0x1f   : > { %s204_s11 = sshll.u32 %s202_s10, 4  ;;  %s194_s14 = scalar_lea.sflag [#allocation3], %s193_s5  ;;  %s205_s11 = int_to_ptr.hbm [resolvable:$true] %s204_s11 }
  0x20   : > { %p1020_p3 = pnand %p605_p1, %p249_p2  ;;  %s236_s29 = scalar_lea.vmem [#allocation7], %s599_s6 }
  0x21   : > { %s221_s12 = scalar_lea.hbm %s1134_s1, %s600_s7  ;;  %s244_s17 = sshll.u32 %s236_s29, 4  ;;  %s245_s17 = int_to_ptr.vmem [resolvable:$true] %s244_s17 }
  0x22   : > { %s223_s13 = sshll.u32 %s221_s12, 4  ;;  %s197_s12 = scalar_lea.vmem [#allocation2], %s599_s6  ;;  %s224_s13 = int_to_ptr.hbm [resolvable:$true] %s223_s13 }
  0x23   : > { %636 = dma.hbm_to_vmem [thread:$0]  (!%p1008_p0), %s224_s13, 128, %s226_s22, %s214_s24  }
  0x24   : > { %s206_s1 = sshll.u32 %s197_s12, 4  ;;  %s240_s22 = scalar_lea.hbm %s1118_s2, %s600_s7  ;;  %s207_s1 = int_to_ptr.vmem [resolvable:$true] %s206_s1 }
  0x25   : > { %633 = dma.hbm_to_vmem [thread:$0]  (!%p1008_p0), %s205_s11, 128, %s207_s1, %s194_s14  }
  0x26   : > { %s242_s19 = sshll.u32 %s240_s22, 4  ;;  %253 = sbr.rel (%p1020_p3) target bundleno = 570 (0x23a), region = 32  ;;  %s243_s19 = int_to_ptr.hbm [resolvable:$true] %s242_s19 }
  0x27   : > { %639 = dma.hbm_to_vmem [thread:$0]  (!%p1008_p0), %s243_s19, 128, %s245_s17, %s214_s24  }
  0x28   : > { %s1037_s23 = sand.u32 (!%p1020_p3), 1, %s893_s16  }
  0x29   : > { %s1040_s1 = sshll.u32 (!%p1020_p3), %s1037_s23, 3  ;;  %s256_s5 = scalar_lea.sflag (!%p1020_p3), [#allocation3], %s1037_s23 }
  0x2a   : > { %s259_s7 = scalar_lea.vmem (!%p1020_p3), [#allocation2], %s1040_s1 }
  0x2b   : > { %872 = dma.done.wait (%p987_p8), %s256_s5, 128  }
  0x2c   : > { %874 = vsyncadd (%p987_p8), %s256_s5, 4294967168  ;;  %s265_s17 = sand.u32 1, %s967_s21   ;;  %s269_s29 = scalar_lea.vmem [#allocation5], %s1040_s1 }
  0x2d   : > { %s266_s19 = scalar_lea.sflag [#allocation6], %s265_s17 }
  0x2e   : > { %876 = dma.done.wait (%p987_p8), %s266_s19, 256  }
  0x2f   : > { %878 = vsyncadd (%p987_p8), %s266_s19, 4294967040  ;;  %vm324_vm0 = vcmask 261120   ;;  %v322_v0 = vld [vmem:[%s269_s29] sm:$0xff]  ;;  %v320_v1 = vld [vmem:[%s259_s7] sm:$0xff]  ;;  %vm351_vm1 = vcmask 64512   ;;  %s279_s21 = scalar_lea.vmem [#allocation7], %s1040_s1 }
  0x30   : > { %611 = vmatpush.xpose.msk.msra.mxu0 %vm324_vm0, %v322_v0  ;;  %v321_v2 = vmul.f32 0.17677669, %v320_v1  ;;  %v323_v10 = vld [vmem:[%s279_s21] sm:$0xff]  ;;  %s616_s27 = sshll.u32 %s901_s18, 3  ;;  %s319_s25 = scalar_lea.vmem [#allocation9], %s1040_s1 }
  0x31   : > { %394 = vmatpush.msra.mxu1 %v323_v10  ;;  %s433_s24 = scalar_lea.hbm %s1120_s4, %s616_s27  ;;  %s435_s26 = sshll.u32 %s319_s25, 4  ;;  %s436_s26 = int_to_ptr.vmem [resolvable:$true] %s435_s26 }
  0x32   : > { %s437_s10 = sshll.u32 %s433_s24, 4  ;;  %s407_s11 = scalar_lea.sflag [#allocation10], %s1037_s23  ;;  %s438_s10 = int_to_ptr.hbm [resolvable:$true] %s437_s10 }
  0x33   : > { %612 = vmatmul.msk.f32.vlgmr.msra.gmra.mxu0 %vm324_vm0, %v321_v2  ;;  %s805_s18 = sshra.s32 %s438_s10, 4  ;;  %s811_s13 = scalar_lea.hbm %s1120_s4, 16  ;;  %s806_s18 = int_to_ptr.hbm [resolvable:$true] %s805_s18 }
  0x34   : > { %s807_s12 = scalar_lea.hbm %s806_s18, 8  ;;  %p812_p7 = scmp.lt.s32.totalorder %s806_s18, %s1120_s4 }
  0x35   : > { %p808_p4 = scmp.ne.s32.totalorder %s806_s18, %s807_s12  ;;  %p813_p8 = scmp.lt.s32.totalorder %s811_s13, %s807_s12 }
  0x37   : > { %p809_p5 = pnand %p808_p4, %p991_p9  ;;  %p814_p10 = por %p813_p8, %p812_p7 }
  0x39   : > { %p810_p6 = pneg %p809_p5 }
  0x3b   : > { %p815_p13 = pnand %p814_p10, %p810_p6 }
  0xb0   : > { %v348_v3 = vpop.f32.mrf.mxu0 }
  0xb1   : > { %v352_v4 = vsel %vm351_vm1, %v348_v3, -inf }
  0xb2   : > { %353 = vmax.xlane.f32.xlu0 %v352_v4 }
 0x125   : > { %v354_v5 = vpop.xlane.xlu0 %353 }
 0x126   : > { %v355_v6 = vsub.f32 %v348_v3, %v354_v5 }
 0x128   : > { %v356_v7 = vmul.f32 1.442695, %v355_v6 }
 0x12a   : > { %697 = vpow2.f32 %v356_v7 }
 0x130   : > { %v698_v8 = vpop.eup %697 }
 0x131   : > { %v358_v9 = vsel %vm351_vm1, %v698_v8, 0.0 }
 0x132   : > { %359 = vadd.xlane.f32.xlu0 %v358_v9 }
 0x1a5   : > { %v360_v11 = vpop.xlane.xlu0 %359 }
 0x1a6   : > { %699 = vrcp.f32 %v360_v11  ;;  %v372_v15 = vand.u32 2147483648, %v360_v11  ;;  %v370_v17 = vand.u32 2147483647, %v360_v11  ;;  %vm366_vm3 = vweird.f32 %v360_v11 }
 0x1a8   : > { %v373_v19 = vor.u32 1.1754944e-38, %v372_v15  ;;  %vm371_vm5 = vcmp.eq.f32.partialorder %v370_v17, 8.507059e+37 }
 0x1ac   : > { %v700_v12 = vpop.eup %699 }
 0x1ad   : > { %v362_v13 = vmul.f32 %v700_v12, %v360_v11  ;;  %vm367_vm2 = vweird.f32 %v700_v12 }
 0x1ae   : > { %vm368_vm4 = vmor %vm366_vm3, %vm367_vm2 }
 0x1af   : > { %v363_v14 = vsub.f32 1.0, %v362_v13 }
 0x1b1   : > { %v364_v16 = vmul.f32 %v700_v12, %v363_v14 }
 0x1b3   : > { %v365_v18 = vadd.f32 %v700_v12, %v364_v16 }
 0x1b5   : > { %v369_v20 = vsel %vm368_vm4, %v700_v12, %v365_v18 }
 0x1b6   : > { %v374_v21 = vsel %vm371_vm5, %v373_v19, %v369_v20 }
 0x1b7   : > { %v375_v22 = vmul.f32 %v698_v8, %v374_v21 }
 0x1b9   : > { %613 = vmatmul.msk.f32.vlgmr.msra.gmra.mxu1 %vm351_vm1, %v375_v22  ;;  %399 = vst.msk [vmem:[%s319_s25] sm:$0xff] %vm351_vm1, %v375_v22 }
 0x1ba   : > { %818 = shalt.err (!%p815_p13)
}
 0x1bb   : > { %627 = dma.vmem_to_hbm [thread:$0]  (%p991_p9), %s436_s26, 128, %s438_s10, %s407_s11  }
 0x1bc   : > { %s418_s19 = scalar_lea.hbm %s1119_s3, %s616_s27  ;;  %s312_s29 = scalar_lea.vmem [#allocation8], %s1040_s1 }
 0x1bd   : > { %s420_s21 = sshll.u32 %s312_s29, 4  ;;  %s422_s6 = sshll.u32 %s418_s19, 4  ;;  %s421_s21 = int_to_ptr.vmem [resolvable:$true] %s420_s21  ;;  %s423_s6 = int_to_ptr.hbm [resolvable:$true] %s422_s6 }
 0x1be   : > { %s402_s8 = scalar_lea.sflag [#allocation4], %s1037_s23  ;;  %s833_s24 = sshra.s32 %s423_s6, 4  ;;  %s834_s24 = int_to_ptr.hbm [resolvable:$true] %s833_s24 }
 0x1bf   : > { %s835_s25 = scalar_lea.hbm %s834_s24, 8  ;;  %s839_s27 = scalar_lea.hbm %s1119_s3, 16 }
 0x1c0   : > { %p836_p0 = scmp.ne.s32.totalorder %s834_s24, %s835_s25  ;;  %p840_p3 = scmp.lt.s32.totalorder %s834_s24, %s1119_s3 }
 0x1c1   : > { %p841_p4 = scmp.lt.s32.totalorder %s839_s27, %s835_s25 }
 0x1c2   : > { %p837_p1 = pnand %p836_p0, %p991_p9 }
 0x1c3   : > { %p842_p5 = por %p841_p4, %p840_p3 }
 0x1c4   : > { %p838_p2 = pneg %p837_p1 }
 0x1c6   : > { %p843_p6 = pnand %p842_p5, %p838_p2 }
 0x236   : > { %v396_v23 = vpop.f32.mrf.mxu1 }
 0x237   : > { %400 = vst.msk [vmem:[%s312_s29] sm:$0xff] %vm324_vm0, %v396_v23 }
 0x238   : > { %846 = shalt.err (!%p843_p6)
}
 0x239   : > { %626 = dma.vmem_to_hbm [thread:$0]  (%p991_p9), %s421_s21, 128, %s423_s6, %s402_s8  }
 0x23a PF: > { %s449_s23 = sand.u32 1, %s889_s15   ;;  %p641_p7 = pnand %p598_p12, %p998_p11 }
 0x23b   : > { %s450_s18 = scalar_lea.sflag [#allocation4], %s449_s23 }
 0x23c   : > { %p642_p8 = pneg %p641_p7 }
 0x23e   : > { %880 = dma.done.wait (%p642_p8), %s450_s18, 128  }
 0x23f   : > { %882 = vsyncadd (%p642_p8), %s450_s18, 4294967168  ;;  %s460_s12 = scalar_lea.sflag [#allocation10], %s449_s23 }
 0x240   : > { %884 = dma.done.wait (%p642_p8), %s460_s12, 128  }
 0x241   : > { %886 = vsyncadd (%p642_p8), %s460_s12, 4294967168  ;;  %s27_s20 = sadd.s32 1, %s909_s20   ;;  %s1136_s28 = sld [smem:[#allocation15_spill]] }
 0x242   : > { %p24_p10 = scmp.ge.s32.totalorder %s27_s20, 4   ;;  %s1137_s17 = sld [smem:[#allocation18_spill]] }
 0x243   : > { %s1138_s18 = sld [smem:[#allocation16_spill]]  ;;  %s1140_s15 = smov %s893_s16 }
 0x244   : > { %s1139_s19 = sld [smem:[#allocation17_spill]]  ;;  %26 = sbr.rel (!%p24_p10) target bundleno = 12 (0xc), region = 118 }
 0x247   : > { %s1141_s16 = smov %s1136_s28 }
 0x249   :  { %466 = vsyncpa [#allocation3], 1 }
 0x24a   :  { %468 = vsyncpa [#allocation3 + $0x1], 1 }
 0x24b   :  { %469 = vsyncpa [#allocation6], 1 }
 0x24c   :  { %471 = vsyncpa [#allocation6 + $0x1], 1 }
 0x24d   :  { %472 = vsyncpa [#allocation4], 1 }
 0x24e   :  { %474 = vsyncpa [#allocation4 + $0x1], 1 }
 0x24f   :  { %475 = vsyncpa [#allocation10], 1 }
 0x250   :  { %477 = vsyncpa [#allocation10 + $0x1], 1 }

</bundles_post_ra>
